<compile_context>
chip_gen: v5e
topology: v5e:2x2
jax: 0.10.0
libtpu: 0.0.40
codegen_flags: <defaults>
</compile_context>

<pallas_src>
import jax
import jax.numpy as jnp
from jax.experimental import pallas as pl
from jax.experimental.pallas import tpu as pltpu


def _round_up(n, m):
    return ((n + m - 1) // m) * m


def value_net_kernel(x_ref, a_ref, w1_ref, b1_ref, w2_ref, b2_ref, w3_ref, b3_ref,
                     out_ref, xa_ref):
    sd = x_ref.shape[1]

    # Fused "concat": stage x | a side by side in a bf16 VMEM scratch so layer 1
    # is one MXU dot over K = state_dim + action_dim (one padded-K pass, not two).
    xa_ref[:, :sd] = x_ref[...]
    xa_ref[:, sd:] = a_ref[...]

    # Layer 1: bf16 operands, f32 accumulation; bias + ReLU; requantize to bf16.
    h1 = jnp.dot(xa_ref[...], w1_ref[...], preferred_element_type=jnp.float32)
    h1 = jnp.maximum(h1 + b1_ref[...], 0.0).astype(jnp.bfloat16)          # (tb, H)

    # Layer 2: bf16 matmul, f32 accumulation, bias + ReLU.
    h2 = jnp.dot(h1, w2_ref[...], preferred_element_type=jnp.float32)
    h2 = jnp.maximum(h2 + b2_ref[...], 0.0).astype(jnp.bfloat16)          # (tb, H2)

    # Layer 3 (out_features == 1): contract against the transposed activations so
    # the result lands lane-dense as (1, tb) -> unmasked stores + dense writeback.
    v = jnp.dot(w3_ref[...], h2.T, preferred_element_type=jnp.float32)    # (1, tb)
    out_ref[...] = (v + b3_ref[...])[None].astype(out_ref.dtype)          # (1,1,tb)


def value_net_continuous(x, a, params, *, max_batch_tile=4096):
    """Forward pass of ValueNetContinuous.

    x: (B, state_dim) f32, a: (B, action_dim) f32.
    params: dict with w1 (state_dim+action_dim, H), b1 (1, H),
            w2 (H, H2), b2 (1, H2), w3 (H2, 1), b3 (1, 1).
    Returns (B, 1) f32.
    """
    B, state_dim = x.shape
    _, action_dim = a.shape
    d_in = state_dim + action_dim
    H = params["w1"].shape[1]
    H2 = params["w2"].shape[1]

    # bf16 streamed activations and resident weights; biases stay f32 and every
    # dot accumulates in f32 on the MXU.
    xb = x.astype(jnp.bfloat16)
    ab = a.astype(jnp.bfloat16)
    w1 = params["w1"].astype(jnp.bfloat16)                     # (d_in, H)
    w2 = params["w2"].astype(jnp.bfloat16)                     # (H, H2)
    w3 = params["w3"].reshape(1, H2).astype(jnp.bfloat16)      # (1, H2)
    b1 = params["b1"].astype(jnp.float32)
    b2 = params["b2"].astype(jnp.float32)
    b3 = params["b3"].reshape(1, 1).astype(jnp.float32)

    # Batch tile: multiple of 16 (bf16 packing). For B > 16 guarantee >= 2 grid
    # steps (v7x megacore); cap at 4096 rows to stay inside v7x's 64 MiB VMEM.
    if B <= 16:
        tb = B
    else:
        tb = min(max_batch_tile, _round_up(pl.cdiv(B, 2), 16))
    num_tiles = pl.cdiv(B, tb)

    def tiled(shape):      # batch-tiled operands
        return pl.BlockSpec(shape, lambda i: (i, 0))

    def resident(shape):   # weights/biases: same block every step -> VMEM-resident
        return pl.BlockSpec(shape, lambda i: (0, 0))

    flops = 2 * B * (d_in * H + H * H2 + H2)
    bytes_accessed = (2 * B * d_in                          # bf16 x, a
                      + 2 * (d_in * H + H * H2 + H2)        # bf16 weights
                      + 4 * (H + H2 + 1)                    # f32 biases
                      + 4 * num_tiles * tb)                 # f32 output slab

    out = pl.pallas_call(
        value_net_kernel,
        out_shape=jax.ShapeDtypeStruct((num_tiles, 1, tb), jnp.float32),
        grid=(num_tiles,),
        in_specs=[
            tiled((tb, state_dim)),
            tiled((tb, action_dim)),
            resident((d_in, H)),
            resident((1, H)),
            resident((H, H2)),
            resident((1, H2)),
            resident((1, H2)),
            resident((1, 1)),
        ],
        out_specs=pl.BlockSpec((1, 1, tb), lambda i: (i, 0, 0)),
        scratch_shapes=[pltpu.VMEM((tb, d_in), jnp.bfloat16)],
        compiler_params=pltpu.CompilerParams(
            dimension_semantics=("parallel",),
            vmem_limit_bytes=48 * 1024 * 1024,
        ),
        cost_estimate=pl.CostEstimate(
            flops=flops, transcendentals=0, bytes_accessed=bytes_accessed),
    )(xb, ab, w1, b1, w2, b2, w3, b3)

    # Lane-dense (num_tiles, 1, tb) slab -> (B, 1); drop any ragged-tile padding.
    return out.reshape(num_tiles * tb)[:B].reshape(B, 1)


def init_params(key, state_dim, hidden_dim, action_dim):
    """Deterministic init mimicking nn.Linear's U(-1/sqrt(fan_in), 1/sqrt(fan_in))."""
    d_in = state_dim + action_dim
    h2 = hidden_dim // 2
    ks = jax.random.split(key, 6)

    def lin(kw, kb, fan_in, fan_out):
        bound = 1.0 / jnp.sqrt(jnp.float32(fan_in))
        w = jax.random.uniform(kw, (fan_in, fan_out), jnp.float32, -bound, bound)
        b = jax.random.uniform(kb, (1, fan_out), jnp.float32, -bound, bound)
        return w, b

    w1, b1 = lin(ks[0], ks[1], d_in, hidden_dim)
    w2, b2 = lin(ks[2], ks[3], hidden_dim, h2)
    w3, b3 = lin(ks[4], ks[5], h2, 1)
    return dict(w1=w1, b1=b1, w2=w2, b2=b2, w3=w3, b3=b3)


def reference_forward_f32(x, a, p):
    cat = jnp.concatenate([x, a], axis=1)
    h1 = jnp.maximum(cat @ p["w1"] + p["b1"], 0.0)
    h2 = jnp.maximum(h1 @ p["w2"] + p["b2"], 0.0)
    return h2 @ p["w3"] + p["b3"]


def reference_forward_bf16(x, a, p):
    """Emulates the kernel's bf16-operand / f32-accumulate numerics."""
    bf = lambda t: t.astype(jnp.bfloat16).astype(jnp.float32)
    cat = jnp.concatenate([bf(x), bf(a)], axis=1)
    h1 = bf(jnp.maximum(cat @ bf(p["w1"]) + p["b1"], 0.0))
    h2 = bf(jnp.maximum(h1 @ bf(p["w2"]) + p["b2"], 0.0))
    return h2 @ bf(p["w3"]) + p["b3"]


if __name__ == "__main__":
    state_dim, hidden_dim, action_dim = 16, 32, 4
    batch = 8

    key = jax.random.PRNGKey(0)
    kx, ka, kp = jax.random.split(key, 3)
    x = jax.random.normal(kx, (batch, state_dim), jnp.float32)
    a = jax.random.normal(ka, (batch, action_dim), jnp.float32)
    params = init_params(kp, state_dim, hidden_dim, action_dim)

    fwd = jax.jit(value_net_continuous)
    out = jax.block_until_ready(fwd(x, a, params))

    ref_bf16 = reference_forward_bf16(x, a, params)   # matches kernel numerics
    ref_f32 = reference_forward_f32(x, a, params)     # exact module semantics
    assert out.shape == (batch, 1)
    assert jnp.allclose(out, ref_bf16, atol=2e-3, rtol=2e-3)
    assert jnp.allclose(out, ref_f32, atol=5e-2, rtol=5e-2)
    print("KERNEL_OK")
</pallas_src>

<mosaic_0001>
module attributes {stable_mosaic.version = 11 : i64} {
  func.func @value_net_kernel(%arg0: i32, %arg1: memref<8x16xbf16, #tpu.memory_space<vmem>>, %arg2: memref<8x4xbf16, #tpu.memory_space<vmem>>, %arg3: memref<20x32xbf16, #tpu.memory_space<vmem>>, %arg4: memref<1x32xf32, #tpu.memory_space<vmem>>, %arg5: memref<32x16xbf16, #tpu.memory_space<vmem>>, %arg6: memref<1x16xf32, #tpu.memory_space<vmem>>, %arg7: memref<1x16xbf16, #tpu.memory_space<vmem>>, %arg8: memref<1x1xf32, #tpu.memory_space<vmem>>, %arg9: memref<1x1x8xf32, #tpu.memory_space<vmem>>, %arg10: memref<8x20xbf16, #tpu.memory_space<vmem>>) attributes {dimension_semantics = [#tpu.dimension_semantics<parallel>], iteration_bounds = array<i64: 1>, scalar_prefetch = 0 : i64, scratch_operands = 1 : i64, tpu.core_type = #tpu.core_type<tc>, window_params = [{transform_indices = @transform_0, window_bounds = array<i64: 8, 16>}, {transform_indices = @transform_1, window_bounds = array<i64: 8, 4>}, {pipeline_mode = #tpu.pipeline_mode<synchronous>, transform_indices = @transform_2, window_bounds = array<i64: 20, 32>}, {pipeline_mode = #tpu.pipeline_mode<synchronous>, transform_indices = @transform_3, window_bounds = array<i64: 1, 32>}, {pipeline_mode = #tpu.pipeline_mode<synchronous>, transform_indices = @transform_4, window_bounds = array<i64: 32, 16>}, {pipeline_mode = #tpu.pipeline_mode<synchronous>, transform_indices = @transform_5, window_bounds = array<i64: 1, 16>}, {pipeline_mode = #tpu.pipeline_mode<synchronous>, transform_indices = @transform_6, window_bounds = array<i64: 1, 16>}, {pipeline_mode = #tpu.pipeline_mode<synchronous>, transform_indices = @transform_7, window_bounds = array<i64: 1, 1>}, {transform_indices = @transform_8, window_bounds = array<i64: 1, 1, 8>}]} {
    %c0 = arith.constant 0 : index
    %c0_0 = arith.constant 0 : index
    %0 = vector.load %arg1[%c0, %c0_0] : memref<8x16xbf16, #tpu.memory_space<vmem>>, vector<8x16xbf16>
    %c0_1 = arith.constant 0 : index
    %c0_2 = arith.constant 0 : index
    %1 = vector.load %arg10[%c0_1, %c0_2] : memref<8x20xbf16, #tpu.memory_space<vmem>>, vector<8x16xbf16>
    tpu.vector_store %arg10[%c0_1, %c0_2], %0 {strides = array<i32>} : memref<8x20xbf16, #tpu.memory_space<vmem>>, vector<8x16xbf16>,
    %c0_3 = arith.constant 0 : index
    %c0_4 = arith.constant 0 : index
    %2 = vector.load %arg2[%c0_3, %c0_4] : memref<8x4xbf16, #tpu.memory_space<vmem>>, vector<8x4xbf16>
    %c0_5 = arith.constant 0 : index
    %c16 = arith.constant 16 : index
    %3 = vector.load %arg10[%c0_5, %c16] : memref<8x20xbf16, #tpu.memory_space<vmem>>, vector<8x4xbf16>
    tpu.vector_store %arg10[%c0_5, %c16], %2 {strides = array<i32>} : memref<8x20xbf16, #tpu.memory_space<vmem>>, vector<8x4xbf16>,
    %c0_6 = arith.constant 0 : index
    %c0_7 = arith.constant 0 : index
    %4 = vector.load %arg10[%c0_6, %c0_7] : memref<8x20xbf16, #tpu.memory_space<vmem>>, vector<8x20xbf16>
    %c0_8 = arith.constant 0 : index
    %c0_9 = arith.constant 0 : index
    %5 = vector.load %arg3[%c0_8, %c0_9] : memref<20x32xbf16, #tpu.memory_space<vmem>>, vector<20x32xbf16>
    %cst = arith.constant dense<0.000000e+00> : vector<8x32xf32>
    %6 = tpu.matmul %4, %5, %cst {dimension_numbers = #tpu.dot_dimension_numbers<[1], [0], [0], [1], [0, 0, 1, 1], [], []>} : vector<8x20xbf16>, vector<20x32xbf16>, vector<8x32xf32> -> vector<8x32xf32>
    %c0_10 = arith.constant 0 : index
    %c0_11 = arith.constant 0 : index
    %7 = vector.load %arg4[%c0_10, %c0_11] : memref<1x32xf32, #tpu.memory_space<vmem>>, vector<1x32xf32>
    %8 = vector.broadcast %7 : vector<1x32xf32> to vector<8x32xf32>
    %9 = arith.addf %6, %8 : vector<8x32xf32>
    %cst_12 = arith.constant 0.000000e+00 : f32
    %10 = vector.broadcast %cst_12 : f32 to vector<8x32xf32>
    %11 = arith.maximumf %9, %10 : vector<8x32xf32>
    %12 = arith.truncf %11 : vector<8x32xf32> to vector<8x32xbf16>
    %c0_13 = arith.constant 0 : index
    %c0_14 = arith.constant 0 : index
    %13 = vector.load %arg5[%c0_13, %c0_14] : memref<32x16xbf16, #tpu.memory_space<vmem>>, vector<32x16xbf16>
    %cst_15 = arith.constant dense<0.000000e+00> : vector<8x16xf32>
    %14 = tpu.matmul %12, %13, %cst_15 {dimension_numbers = #tpu.dot_dimension_numbers<[1], [0], [0], [1], [0, 0, 1, 1], [], []>} : vector<8x32xbf16>, vector<32x16xbf16>, vector<8x16xf32> -> vector<8x16xf32>
    %c0_16 = arith.constant 0 : index
    %c0_17 = arith.constant 0 : index
    %15 = vector.load %arg6[%c0_16, %c0_17] : memref<1x16xf32, #tpu.memory_space<vmem>>, vector<1x16xf32>
    %16 = vector.broadcast %15 : vector<1x16xf32> to vector<8x16xf32>
    %17 = arith.addf %14, %16 : vector<8x16xf32>
    %cst_18 = arith.constant 0.000000e+00 : f32
    %18 = vector.broadcast %cst_18 : f32 to vector<8x16xf32>
    %19 = arith.maximumf %17, %18 : vector<8x16xf32>
    %20 = arith.truncf %19 : vector<8x16xf32> to vector<8x16xbf16>
    %c0_19 = arith.constant 0 : index
    %c0_20 = arith.constant 0 : index
    %21 = vector.load %arg7[%c0_19, %c0_20] : memref<1x16xbf16, #tpu.memory_space<vmem>>, vector<1x16xbf16>
    %22 = tpu.transpose %20, [1, 0] : vector<8x16xbf16> -> vector<16x8xbf16>
    %cst_21 = arith.constant dense<0.000000e+00> : vector<1x8xf32>
    %23 = tpu.matmul %21, %22, %cst_21 {dimension_numbers = #tpu.dot_dimension_numbers<[1], [0], [0], [1], [0, 0, 1, 1], [], []>} : vector<1x16xbf16>, vector<16x8xbf16>, vector<1x8xf32> -> vector<1x8xf32>
    %c0_22 = arith.constant 0 : index
    %c0_23 = arith.constant 0 : index
    %24 = vector.load %arg8[%c0_22, %c0_23] : memref<1x1xf32, #tpu.memory_space<vmem>>, vector<1x1xf32>
    %25 = vector.broadcast %24 : vector<1x1xf32> to vector<1x8xf32>
    %26 = arith.addf %23, %25 : vector<1x8xf32>
    %27 = vector.shape_cast %26 : vector<1x8xf32> to vector<1x1x8xf32>
    %c0_24 = arith.constant 0 : index
    %c0_25 = arith.constant 0 : index
    %c0_26 = arith.constant 0 : index
    %28 = vector.load %arg9[%c0_24, %c0_25, %c0_26] : memref<1x1x8xf32, #tpu.memory_space<vmem>>, vector<1x1x8xf32>
    tpu.vector_store %arg9[%c0_24, %c0_25, %c0_26], %27 {strides = array<i32>} : memref<1x1x8xf32, #tpu.memory_space<vmem>>, vector<1x1x8xf32>,
    return
  }
  func.func @transform_0(%arg0: i32) -> (i32, i32) {
    %c0_i32 = arith.constant 0 : i32
    %c0_i32_0 = arith.constant 0 : i32
    return %arg0, %c0_i32 : i32, i32
  }
  func.func @transform_1(%arg0: i32) -> (i32, i32) {
    %c0_i32 = arith.constant 0 : i32
    %c0_i32_0 = arith.constant 0 : i32
    return %arg0, %c0_i32 : i32, i32
  }
  func.func @transform_2(%arg0: i32) -> (i32, i32) {
    %c0_i32 = arith.constant 0 : i32
    %c0_i32_0 = arith.constant 0 : i32
    %c0_i32_1 = arith.constant 0 : i32
    return %c0_i32, %c0_i32_0 : i32, i32
  }
  func.func @transform_3(%arg0: i32) -> (i32, i32) {
    %c0_i32 = arith.constant 0 : i32
    %c0_i32_0 = arith.constant 0 : i32
    %c0_i32_1 = arith.constant 0 : i32
    return %c0_i32, %c0_i32_0 : i32, i32
  }
  func.func @transform_4(%arg0: i32) -> (i32, i32) {
    %c0_i32 = arith.constant 0 : i32
    %c0_i32_0 = arith.constant 0 : i32
    %c0_i32_1 = arith.constant 0 : i32
    return %c0_i32, %c0_i32_0 : i32, i32
  }
  func.func @transform_5(%arg0: i32) -> (i32, i32) {
    %c0_i32 = arith.constant 0 : i32
    %c0_i32_0 = arith.constant 0 : i32
    %c0_i32_1 = arith.constant 0 : i32
    return %c0_i32, %c0_i32_0 : i32, i32
  }
  func.func @transform_6(%arg0: i32) -> (i32, i32) {
    %c0_i32 = arith.constant 0 : i32
    %c0_i32_0 = arith.constant 0 : i32
    %c0_i32_1 = arith.constant 0 : i32
    return %c0_i32, %c0_i32_0 : i32, i32
  }
  func.func @transform_7(%arg0: i32) -> (i32, i32) {
    %c0_i32 = arith.constant 0 : i32
    %c0_i32_0 = arith.constant 0 : i32
    %c0_i32_1 = arith.constant 0 : i32
    return %c0_i32, %c0_i32_0 : i32, i32
  }
  func.func @transform_8(%arg0: i32) -> (i32, i32, i32) {
    %c0_i32 = arith.constant 0 : i32
    %c0_i32_0 = arith.constant 0 : i32
    %c0_i32_1 = arith.constant 0 : i32
    return %arg0, %c0_i32, %c0_i32_0 : i32, i32, i32
  }
}

</mosaic_0001>

<bundles_post_ra>
// kernel: value_net_continuous.1
= control target key start
LH: loop header
LB: loop body
LE: loop exit
PB: predicated region body
PF: predicated region fallthrough
CT: control target
= control target key end

     0   :  { %s299_s0 = inlined_call_operand.vmem [shape: bf16[8,16], index: 0, kind: input, shape index: {}]   ;;  %s300_s1 = inlined_call_operand.vmem [shape: bf16[8,4], index: 1, kind: input, shape index: {}]   ;;  %s301_s2 = inlined_call_operand.vmem [shape: bf16[20,32], index: 2, kind: input, shape index: {}]   ;;  %s302_s3 = inlined_call_operand.vmem [shape: f32[1,32], index: 3, kind: input, shape index: {}]   ;;  %s303_s4 = inlined_call_operand.vmem [shape: bf16[32,16], index: 4, kind: input, shape index: {}]   ;;  %s304_s5 = inlined_call_operand.vmem [shape: f32[1,16], index: 5, kind: input, shape index: {}]   ;;  %s305_s6 = inlined_call_operand.vmem [shape: bf16[1,16], index: 6, kind: input, shape index: {}]   ;;  %s306_s7 = inlined_call_operand.<no memory space> [shape: f32[1,1], index: 7, kind: input, shape index: {}]   ;;  %s307_s8 = inlined_call_operand.hbm [shape: f32[1,1,8], index: 8, kind: output, shape index: {}]  }
   0x1   :  { %v13_v0 = vstv %s306_s7 }
   0x2   :  { %14 = vst [vmem:[#allocation3] sm:$0x1] %v13_v0 }
   0x3   :  { %v36_v1 = vld [vmem:[%s300_s1] sm:$0xf]  ;;  %s218_s9 = smov 16  }
   0x4   :  { %38 = vrot.lane.b32.xlu0 %v36_v1, %s218_s9 }
   0x5   :  { %15 = vsyncpa [#allocation5], 0  ;;  %v46_v2 = vld [vmem:[%s301_s2 + $0x8] sm:$0x3]  ;;  %v33_v4 = vld [vmem:[%s299_s0] sm:$0xf] }
   0x6   :  { %v56_v3 = vunpack.c.l.b16 %v46_v2  ;;  %vm34_vm0 = vcmask 125952   ;;  %vm64_vm1 = vcmask 1041408   ;;  %v183_v7 = vld [vmem:[%s301_s2] sm:$0xff]  ;;  %vm41_vm2 = vcmask 158848   ;;  %v185_v10 = vld [vmem:[%s303_s4 + $0x8] sm:$0xff]  ;;  %s220_s20 = smov [#allocation4]  }
   0x7   :  { %35 = vst.msk [vmem:[#allocation2] sm:$0xf] %vm34_vm0, %v33_v4  ;;  %vm60_vm3 = vcmask 162816   ;;  %113 = vmatpush.bf16.msra.mxu1 %v185_v10  ;;  %v184_v11 = vld [vmem:[%s303_s4] sm:$0xff]  ;;  %vm103_vm4 = vcmask 261120   ;;  %v219_v19 = vmov 0  }
   0x8   :  { %v58_v5 = vpack.c.b16 %v56_v3, %v56_v3  ;;  %v190_v12 = vld [vmem:[%s302_s3] ss:$0 sm:$0xff]  ;;  %189 = vset.pattern.permute.xlu0 %v219_v19  ;;  %vm130_vm5 = vcmask 130048   ;;  %s157_s21 = sshll.u32 %s220_s20, 4  ;;  %vm150_vm6 = vcmask 57344   ;;  %s158_s21 = int_to_ptr.vmem [resolvable:$true] %s157_s21 }
   0x9   :  { %v123_v18 = vld [vmem:[#allocation3] sm:$0x1]  ;;  %v191_v20 = vld [vmem:[%s304_s5] ss:$0 sm:$0xff]  ;;  %s159_s5 = sshll.u32 %s307_s8, 4  ;;  %s160_s5 = int_to_ptr.hbm [resolvable:$true] %s159_s5 }
   0xa   :  { %v66_v6 = vsel %vm64_vm1, %v58_v5, 0  ;;  %v122_v27 = vld [vmem:[%s305_s6] sm:$0x1] }
   0xb   :  { %74 = vmatpush.bf16.msra.mxu0 %v66_v6  ;;  %114 = vmatpush.bf16.msra.mxu1 %v184_v11 }
   0xc   :  { %126 = vperm.xlu0 %189, %v123_v18  }
   0xf   :  { %75 = vmatpush.bf16.msra.mxu0 %v183_v7 }
  0x76   :  { %v39_v8 = vpop.permute.xlu0 %38 }
  0x77   :  { %42 = vst.msk [vmem:[#allocation2] sm:$0xf] %vm41_vm2, %v39_v8 }
  0x7e   :  { %v43_v9 = vld [vmem:[#allocation2] sm:$0xf]  ;;  %v127_v28 = vpop.permute.xlu0 %126 }
  0x7f   :  { %172 = vmatmul.msk.bf16.vlgmr.msra.gmra.mxu0 %vm60_vm3, %v43_v9  ;;  %v129_v29 = vperm.slane %v127_v28, 0 }
  0xfc   :  { %v77_v13 = vpop.f32.mrf.mxu0 }
  0xfd   :  { %v78_v14 = vadd.f32 %v190_v12, %v77_v13 }
  0xff   :  { %v81_v15 = vmax.f32 %v78_v14, 0.0 }
 0x101   :  { %v82_v16 = vpack.c.bf16 %v81_v15, %v81_v15 }
 0x103   :  { %181 = vmatmul.msk.bf16.vlgmr.msra.gmra.mxu1 %vm103_vm4, %v82_v16 }
 0x104   :  { %v79_v17 = vpop.f32.mrf.mxu0 }
 0x180   :  { %v116_v21 = vpop.f32.mrf.mxu1 }
 0x181   :  { %v117_v22 = vadd.f32 %v191_v20, %v116_v21 }
 0x183   :  { %v120_v23 = vmax.f32 %v117_v22, 0.0 }
 0x185   :  { %v121_v24 = vpack.c.bf16 %v120_v23, %v120_v23 }
 0x187   :  { %v135_v25 = vsel %vm130_vm5, %v121_v24, 0 }
 0x188   :  { %v118_v26 = vpop.f32.mrf.mxu1  ;;  %144 = vmatpush.bf16.xpose.msra.mxu2 %v135_v25 }
 0x18f   :  { %182 = vmatmul.msk.bf16.vlgmr.msra.gmra.mxu2 %vm130_vm5, %v122_v27 }
 0x212   :  { %v146_v30 = vpop.f32.mrf.mxu2 }
 0x213   :  { %v147_v31 = vadd.f32 %v146_v30, %v129_v29 }
 0x215   :  { %151 = vst.msk [vmem:[#allocation4] sm:$0x1] %vm150_vm6, %v147_v31 }
 0x216   :  { %162 = dma.vmem_to_hbm [thread:$0]  %s158_s21, 16, %s160_s5, [#allocation5]  }
 0x21a   :  { %v148_v32 = vpop.f32.mrf.mxu2 }
 0x21b   :  { %216 = dma.done.wait [#allocation5], 16  }
 0x21c   :  { %217 = vsyncadd [#allocation5], 4294967280 }
 0x21d   :  { %167 = vsyncpa [#allocation5], 1 }

</bundles_post_ra>
